<compile_context>
chip_gen: v7x
topology: tpu7x:2x2x1
jax: 0.10.0
libtpu: 0.0.40
codegen_flags: <defaults>
</compile_context>

<pallas_src>
import math

import jax
import jax.numpy as jnp
from jax.experimental import pallas as pl
from jax.experimental.pallas import tpu as pltpu


# ---------------------------------------------------------------------------
# Pallas kernels
# ---------------------------------------------------------------------------
def _kdash_colmax_kernel(k_ref, proj_ref, out_ref):
    """Column max over a group of heads of k_dash = (normalizer * k) @ proj.T."""
    g, n, d = k_ref.shape
    normalizer = d ** -0.25
    k2 = k_ref[...].reshape(g * n, d)                    # free: N is sublane-aligned
    kd = jax.lax.dot_general(
        normalizer * k2, proj_ref[...],
        dimension_numbers=(((1,), (1,)), ((), ())),      # (G*N, D) x (M, D)^T
        preferred_element_type=jnp.float32,
    )                                                    # (G*N, M)
    out_ref[0] = jnp.max(kd, axis=0, keepdims=True)      # (1, M)


def _fast_attention_kernel(gmax_ref, q_ref, k_ref, v_ref, proj_ref, out_ref):
    """Performer softmax-kernel feature maps + linear attention for G heads."""
    g, n, d = q_ref.shape
    m = proj_ref.shape[0]
    normalizer = d ** -0.25          # data.shape[-1] ** -0.25
    ratio = m ** -0.5                # projection_matrix.shape[0] ** -0.5
    eps = 1e-4

    # Tall (G*N, D) views so the shared-projection matmuls fill MXU rows.
    q2 = q_ref[...].reshape(g * n, d)
    k2 = k_ref[...].reshape(g * n, d)
    proj = proj_ref[...]

    def dash(x2):                    # (G*N, D) x (M, D)^T -> (G*N, M) on the MXU
        return jax.lax.dot_general(
            normalizer * x2, proj,
            dimension_numbers=(((1,), (1,)), ((), ())),
            preferred_element_type=jnp.float32,
        )

    q_dash = dash(q2)                # (G*N, M)
    k_dash = dash(k2)                # (G*N, M)

    scale = 0.5 * normalizer * normalizer
    q_diag = jnp.sum(q2 * q2, axis=-1, keepdims=True) * scale       # (G*N, 1)
    k_diag = jnp.sum(k2 * k2, axis=-1, keepdims=True) * scale       # (G*N, 1)

    # is_query=True: per-row max;  is_query=False: global max (pass 1, in SMEM)
    q_prime = ratio * (jnp.exp(q_dash - q_diag
                               - jnp.max(q_dash, axis=-1, keepdims=True)) + eps)
    k_prime = ratio * (jnp.exp(k_dash - k_diag - gmax_ref[0]) + eps)

    # linear_attention(q', k', v), batched over the G heads of the group.
    q3 = q_prime.reshape(g, n, m)
    k3 = k_prime.reshape(g, n, m)
    v3 = v_ref[...]                                                  # (G, N, D)

    k_cumsum = jnp.sum(k3, axis=1, keepdims=True)                    # (G, 1, M)
    d_inv = pl.reciprocal(jnp.sum(q3 * k_cumsum, axis=-1, keepdims=True),
                          approx=True)                               # (G, N, 1)
    context = jnp.einsum('gnm,gnd->gmd', k3, v3,
                         preferred_element_type=jnp.float32)         # (G, M, D)
    out = jnp.einsum('gnm,gmd->gnd', q3, context,
                     preferred_element_type=jnp.float32)             # (G, N, D)
    out_ref[...] = (out * d_inv).astype(out_ref.dtype)


# ---------------------------------------------------------------------------
# Wrapper
# ---------------------------------------------------------------------------
def _choose_group(bh, n, d, m, vmem_budget_bytes=16 * 1024 * 1024):
    """Largest head-group G (divisor of BH) that fits VMEM and keeps grid >= 2."""
    if n % 8 != 0:
        return 1  # grouping relies on sublane-aligned (G,N,*) <-> (G*N,*) reshapes
    lane = 128
    d_pad = max(lane, -(-d // lane) * lane)
    m_pad = max(lane, -(-m // lane) * lane)
    # rough per-head f32 footprint: q/k/v/out blocks (x2 double-buffer)
    # + dash/prime intermediates + per-head context
    per_head = 4 * (2 * 4 * n * d_pad + 4 * n * m_pad + m_pad * d_pad)
    g = 1
    for cand in range(1, bh + 1):
        if bh % cand:
            continue
        if cand * per_head > vmem_budget_bytes:
            continue
        if bh // cand < 2 and bh >= 2:
            continue  # keep >= 2 grid steps so both TCs (v7x) / megacore get work
        g = cand
    return g


def fast_attention(q, k, v, proj):
    B, H, N, D = q.shape
    M = proj.shape[0]
    BH = B * H
    qf = q.reshape(BH, N, D)
    kf = k.reshape(BH, N, D)
    vf = v.reshape(BH, N, D)

    G = _choose_group(BH, N, D, M)
    num_groups = BH // G

    # ---- pass 1: per-group column max of k_dash, scalar-reduced in JAX glue ----
    kmax_cols = pl.pallas_call(
        _kdash_colmax_kernel,
        out_shape=jax.ShapeDtypeStruct((num_groups, 1, M), jnp.float32),
        grid=(num_groups,),
        in_specs=[
            pl.BlockSpec((G, N, D), lambda i: (i, 0, 0)),
            pl.BlockSpec((M, D), lambda i: (0, 0)),
        ],
        out_specs=pl.BlockSpec((1, 1, M), lambda i: (i, 0, 0)),
        compiler_params=pltpu.CompilerParams(dimension_semantics=("parallel",)),
    )(kf, proj)
    gmax = jnp.max(kmax_cols).reshape(1).astype(jnp.float32)   # (1,) scalar for SMEM

    # ---- pass 2: feature maps + linear attention, G heads per grid step ----
    out = pl.pallas_call(
        _fast_attention_kernel,
        out_shape=jax.ShapeDtypeStruct((BH, N, D), q.dtype),
        grid=(num_groups,),
        in_specs=[
            pl.BlockSpec(memory_space=pltpu.MemorySpace.SMEM),   # global k_dash max
            pl.BlockSpec((G, N, D), lambda i: (i, 0, 0)),        # q
            pl.BlockSpec((G, N, D), lambda i: (i, 0, 0)),        # k
            pl.BlockSpec((G, N, D), lambda i: (i, 0, 0)),        # v
            pl.BlockSpec((M, D), lambda i: (0, 0)),              # projection matrix
        ],
        out_specs=pl.BlockSpec((G, N, D), lambda i: (i, 0, 0)),
        compiler_params=pltpu.CompilerParams(dimension_semantics=("parallel",)),
    )(gmax, qf, kf, vf, proj)
    return out.reshape(B, H, N, D)


# ---------------------------------------------------------------------------
# Deterministic parameter init (gaussian orthogonal random projection)
# ---------------------------------------------------------------------------
def _orthogonal_matrix_chunk(key, cols):
    unstructured = jax.random.normal(key, (cols, cols), jnp.float32)
    qm, _ = jnp.linalg.qr(unstructured)
    return qm.T


def gaussian_orthogonal_random_matrix(key, nb_rows, nb_columns, scaling=0):
    nb_full_blocks = nb_rows // nb_columns
    keys = jax.random.split(key, nb_full_blocks + 2)
    blocks = []
    for i in range(nb_full_blocks):
        blocks.append(_orthogonal_matrix_chunk(keys[i], nb_columns))
    remaining = nb_rows - nb_full_blocks * nb_columns
    if remaining > 0:
        blocks.append(_orthogonal_matrix_chunk(keys[nb_full_blocks], nb_columns)[:remaining])
    final = jnp.concatenate(blocks, axis=0)
    if scaling == 0:
        multiplier = jnp.linalg.norm(
            jax.random.normal(keys[-1], (nb_rows, nb_columns), jnp.float32), axis=1)
    elif scaling == 1:
        multiplier = math.sqrt(float(nb_columns)) * jnp.ones((nb_rows,), jnp.float32)
    else:
        raise ValueError(f"Invalid scaling {scaling}")
    return jnp.diag(multiplier) @ final


# ---------------------------------------------------------------------------
# Pure-JAX reference (f32 everywhere, matches the PyTorch module semantics)
# ---------------------------------------------------------------------------
def fast_attention_ref(q, k, v, proj):
    d = q.shape[-1]
    m = proj.shape[0]
    normalizer = d ** -0.25
    ratio = m ** -0.5
    eps = 1e-4
    hp = jax.lax.Precision.HIGHEST
    q_dash = jnp.einsum("bhnd,md->bhnm", normalizer * q, proj, precision=hp)
    k_dash = jnp.einsum("bhnd,md->bhnm", normalizer * k, proj, precision=hp)
    q_diag = jnp.sum(q * q, -1, keepdims=True) * 0.5 * normalizer ** 2
    k_diag = jnp.sum(k * k, -1, keepdims=True) * 0.5 * normalizer ** 2
    qp = ratio * (jnp.exp(q_dash - q_diag - jnp.max(q_dash, -1, keepdims=True)) + eps)
    kp = ratio * (jnp.exp(k_dash - k_diag - jnp.max(k_dash)) + eps)
    k_cumsum = kp.sum(-2)
    d_inv = 1.0 / jnp.einsum("bhnm,bhm->bhn", qp, k_cumsum, precision=hp)
    context = jnp.einsum("bhnm,bhne->bhme", kp, v, precision=hp)
    return jnp.einsum("bhme,bhnm,bhn->bhne", context, qp, d_inv, precision=hp)


if __name__ == "__main__":
    B, H, N, D = 2, 2, 8, 16
    dim_heads = D
    nb_features = int(dim_heads * math.log(dim_heads))  # default(None, d*ln(d)) = 44

    key = jax.random.PRNGKey(0)
    kq, kk, kv, kproj = jax.random.split(key, 4)
    q = jax.random.normal(kq, (B, H, N, D), jnp.float32)
    k = jax.random.normal(kk, (B, H, N, D), jnp.float32)
    v = jax.random.normal(kv, (B, H, N, D), jnp.float32)
    proj = gaussian_orthogonal_random_matrix(kproj, nb_features, dim_heads, scaling=0)
    proj = proj.astype(jnp.float32)

    out = jax.jit(fast_attention)(q, k, v, proj)
    jax.block_until_ready(out)

    ref = fast_attention_ref(q, k, v, proj)
    assert out.shape == (B, H, N, D)
    # Kernel matmuls use default (single-pass bf16, f32-accumulate) MXU precision,
    # so allow a slightly wider tolerance vs the full-f32 reference.
    assert jnp.allclose(out, ref, atol=3e-2, rtol=3e-2), "kernel does not match reference"

    print("KERNEL_OK")
</pallas_src>

<mosaic_0001>
module attributes {stable_mosaic.version = 11 : i64} {
  func.func @_kdash_colmax_kernel(%arg0: i32, %arg1: memref<2x8x16xf32, #tpu.memory_space<vmem>>, %arg2: memref<44x16xf32, #tpu.memory_space<vmem>>, %arg3: memref<1x1x44xf32, #tpu.memory_space<vmem>>) attributes {dimension_semantics = [#tpu.dimension_semantics<parallel>], iteration_bounds = array<i64: 2>, scalar_prefetch = 0 : i64, scratch_operands = 0 : i64, tpu.core_type = #tpu.core_type<tc>, window_params = [{transform_indices = @transform_0, window_bounds = array<i64: 2, 8, 16>}, {pipeline_mode = #tpu.pipeline_mode<synchronous>, transform_indices = @transform_1, window_bounds = array<i64: 44, 16>}, {transform_indices = @transform_2, window_bounds = array<i64: 1, 1, 44>}]} {
    %c0 = arith.constant 0 : index
    %c0_0 = arith.constant 0 : index
    %c0_1 = arith.constant 0 : index
    %0 = vector.load %arg1[%c0, %c0_0, %c0_1] : memref<2x8x16xf32, #tpu.memory_space<vmem>>, vector<2x8x16xf32>
    %1 = vector.shape_cast %0 : vector<2x8x16xf32> to vector<16x16xf32>
    %cst = arith.constant 5.000000e-01 : f32
    %2 = vector.broadcast %cst : f32 to vector<16x16xf32>
    %3 = arith.mulf %2, %1 : vector<16x16xf32>
    %c0_2 = arith.constant 0 : index
    %c0_3 = arith.constant 0 : index
    %4 = vector.load %arg2[%c0_2, %c0_3] : memref<44x16xf32, #tpu.memory_space<vmem>>, vector<44x16xf32>
    %cst_4 = arith.constant dense<0.000000e+00> : vector<16x44xf32>
    %5 = tpu.matmul %3, %4, %cst_4 {dimension_numbers = #tpu.dot_dimension_numbers<[1], [1], [0], [0], [0, 0, 1, 0], [], []>} : vector<16x16xf32>, vector<44x16xf32>, vector<16x44xf32> -> vector<16x44xf32>
    %cst_5 = arith.constant dense<0xFF800000> : vector<44xf32>
    %6 = vector.multi_reduction <maximumf>, %5, %cst_5 [0] : vector<16x44xf32> to vector<44xf32>
    %7 = vector.shape_cast %6 : vector<44xf32> to vector<1x44xf32>
    %c0_6 = arith.constant 0 : index
    %c0_7 = arith.constant 0 : index
    %c0_8 = arith.constant 0 : index
    %8 = vector.load %arg3[%c0_6, %c0_7, %c0_8] : memref<1x1x44xf32, #tpu.memory_space<vmem>>, vector<1x1x44xf32>
    %9 = vector.shape_cast %8 : vector<1x1x44xf32> to vector<1x44xf32>
    %10 = vector.shape_cast %7 : vector<1x44xf32> to vector<1x1x44xf32>
    tpu.vector_store %arg3[%c0_6, %c0_7, %c0_8], %10 {strides = array<i32>} : memref<1x1x44xf32, #tpu.memory_space<vmem>>, vector<1x1x44xf32>,
    return
  }
  func.func @transform_0(%arg0: i32) -> (i32, i32, i32) {
    %c0_i32 = arith.constant 0 : i32
    %c0_i32_0 = arith.constant 0 : i32
    %c0_i32_1 = arith.constant 0 : i32
    return %arg0, %c0_i32, %c0_i32_0 : i32, i32, i32
  }
  func.func @transform_1(%arg0: i32) -> (i32, i32) {
    %c0_i32 = arith.constant 0 : i32
    %c0_i32_0 = arith.constant 0 : i32
    %c0_i32_1 = arith.constant 0 : i32
    return %c0_i32, %c0_i32_0 : i32, i32
  }
  func.func @transform_2(%arg0: i32) -> (i32, i32, i32) {
    %c0_i32 = arith.constant 0 : i32
    %c0_i32_0 = arith.constant 0 : i32
    %c0_i32_1 = arith.constant 0 : i32
    return %arg0, %c0_i32, %c0_i32_0 : i32, i32, i32
  }
}

module attributes {stable_mosaic.version = 11 : i64} {
  func.func @_fast_attention_kernel(%arg0: i32, %arg1: memref<1xf32, #tpu.memory_space<smem>>, %arg2: memref<2x8x16xf32, #tpu.memory_space<vmem>>, %arg3: memref<2x8x16xf32, #tpu.memory_space<vmem>>, %arg4: memref<2x8x16xf32, #tpu.memory_space<vmem>>, %arg5: memref<44x16xf32, #tpu.memory_space<vmem>>, %arg6: memref<2x8x16xf32, #tpu.memory_space<vmem>>) attributes {dimension_semantics = [#tpu.dimension_semantics<parallel>], iteration_bounds = array<i64: 2>, scalar_prefetch = 0 : i64, scratch_operands = 0 : i64, tpu.core_type = #tpu.core_type<tc>, window_params = [{transform_indices = @transform_0, window_bounds = array<i64: 1>}, {transform_indices = @transform_1, window_bounds = array<i64: 2, 8, 16>}, {transform_indices = @transform_2, window_bounds = array<i64: 2, 8, 16>}, {transform_indices = @transform_3, window_bounds = array<i64: 2, 8, 16>}, {pipeline_mode = #tpu.pipeline_mode<synchronous>, transform_indices = @transform_4, window_bounds = array<i64: 44, 16>}, {transform_indices = @transform_5, window_bounds = array<i64: 2, 8, 16>}]} {
    %c0 = arith.constant 0 : index
    %c0_0 = arith.constant 0 : index
    %c0_1 = arith.constant 0 : index
    %0 = vector.load %arg2[%c0, %c0_0, %c0_1] : memref<2x8x16xf32, #tpu.memory_space<vmem>>, vector<2x8x16xf32>
    %1 = vector.shape_cast %0 : vector<2x8x16xf32> to vector<16x16xf32>
    %c0_2 = arith.constant 0 : index
    %c0_3 = arith.constant 0 : index
    %c0_4 = arith.constant 0 : index
    %2 = vector.load %arg3[%c0_2, %c0_3, %c0_4] : memref<2x8x16xf32, #tpu.memory_space<vmem>>, vector<2x8x16xf32>
    %3 = vector.shape_cast %2 : vector<2x8x16xf32> to vector<16x16xf32>
    %c0_5 = arith.constant 0 : index
    %c0_6 = arith.constant 0 : index
    %4 = vector.load %arg5[%c0_5, %c0_6] : memref<44x16xf32, #tpu.memory_space<vmem>>, vector<44x16xf32>
    %cst = arith.constant 5.000000e-01 : f32
    %5 = vector.broadcast %cst : f32 to vector<16x16xf32>
    %6 = arith.mulf %5, %1 : vector<16x16xf32>
    %cst_7 = arith.constant dense<0.000000e+00> : vector<16x44xf32>
    %7 = tpu.matmul %6, %4, %cst_7 {dimension_numbers = #tpu.dot_dimension_numbers<[1], [1], [0], [0], [0, 0, 1, 0], [], []>} : vector<16x16xf32>, vector<44x16xf32>, vector<16x44xf32> -> vector<16x44xf32>
    %cst_8 = arith.constant 5.000000e-01 : f32
    %8 = vector.broadcast %cst_8 : f32 to vector<16x16xf32>
    %9 = arith.mulf %8, %3 : vector<16x16xf32>
    %cst_9 = arith.constant dense<0.000000e+00> : vector<16x44xf32>
    %10 = tpu.matmul %9, %4, %cst_9 {dimension_numbers = #tpu.dot_dimension_numbers<[1], [1], [0], [0], [0, 0, 1, 0], [], []>} : vector<16x16xf32>, vector<44x16xf32>, vector<16x44xf32> -> vector<16x44xf32>
    %11 = arith.mulf %1, %1 : vector<16x16xf32>
    %cst_10 = arith.constant dense<0.000000e+00> : vector<16xf32>
    %12 = vector.multi_reduction <add>, %11, %cst_10 [1] : vector<16x16xf32> to vector<16xf32>
    %13 = vector.shape_cast %12 : vector<16xf32> to vector<16x1xf32>
    %cst_11 = arith.constant 1.250000e-01 : f32
    %14 = vector.broadcast %cst_11 : f32 to vector<16x1xf32>
    %15 = arith.mulf %13, %14 : vector<16x1xf32>
    %16 = arith.mulf %3, %3 : vector<16x16xf32>
    %cst_12 = arith.constant dense<0.000000e+00> : vector<16xf32>
    %17 = vector.multi_reduction <add>, %16, %cst_12 [1] : vector<16x16xf32> to vector<16xf32>
    %18 = vector.shape_cast %17 : vector<16xf32> to vector<16x1xf32>
    %cst_13 = arith.constant 1.250000e-01 : f32
    %19 = vector.broadcast %cst_13 : f32 to vector<16x1xf32>
    %20 = arith.mulf %18, %19 : vector<16x1xf32>
    %21 = vector.broadcast %15 : vector<16x1xf32> to vector<16x44xf32>
    %22 = arith.subf %7, %21 : vector<16x44xf32>
    %cst_14 = arith.constant dense<0xFF800000> : vector<16xf32>
    %23 = vector.multi_reduction <maximumf>, %7, %cst_14 [1] : vector<16x44xf32> to vector<16xf32>
    %24 = vector.shape_cast %23 : vector<16xf32> to vector<16x1xf32>
    %25 = vector.broadcast %24 : vector<16x1xf32> to vector<16x44xf32>
    %26 = arith.subf %22, %25 : vector<16x44xf32>
    %27 = math.exp %26 : vector<16x44xf32>
    %cst_15 = arith.constant 9.99999974E-5 : f32
    %28 = vector.broadcast %cst_15 : f32 to vector<16x44xf32>
    %29 = arith.addf %27, %28 : vector<16x44xf32>
    %cst_16 = arith.constant 0.150755674 : f32
    %30 = vector.broadcast %cst_16 : f32 to vector<16x44xf32>
    %31 = arith.mulf %30, %29 : vector<16x44xf32>
    %32 = vector.broadcast %20 : vector<16x1xf32> to vector<16x44xf32>
    %33 = arith.subf %10, %32 : vector<16x44xf32>
    %c0_17 = arith.constant 0 : index
    %34 = memref.load %arg1[%c0_17] : memref<1xf32, #tpu.memory_space<smem>>
    %35 = vector.broadcast %34 : f32 to vector<16x44xf32>
    %36 = arith.subf %33, %35 : vector<16x44xf32>
    %37 = math.exp %36 : vector<16x44xf32>
    %cst_18 = arith.constant 9.99999974E-5 : f32
    %38 = vector.broadcast %cst_18 : f32 to vector<16x44xf32>
    %39 = arith.addf %37, %38 : vector<16x44xf32>
    %cst_19 = arith.constant 0.150755674 : f32
    %40 = vector.broadcast %cst_19 : f32 to vector<16x44xf32>
    %41 = arith.mulf %40, %39 : vector<16x44xf32>
    %42 = vector.shape_cast %31 : vector<16x44xf32> to vector<2x8x44xf32>
    %43 = vector.shape_cast %41 : vector<16x44xf32> to vector<2x8x44xf32>
    %c0_20 = arith.constant 0 : index
    %c0_21 = arith.constant 0 : index
    %c0_22 = arith.constant 0 : index
    %44 = vector.load %arg4[%c0_20, %c0_21, %c0_22] : memref<2x8x16xf32, #tpu.memory_space<vmem>>, vector<2x8x16xf32>
    %cst_23 = arith.constant dense<0.000000e+00> : vector<2x44xf32>
    %45 = vector.multi_reduction <add>, %43, %cst_23 [1] : vector<2x8x44xf32> to vector<2x44xf32>
    %46 = vector.shape_cast %45 : vector<2x44xf32> to vector<2x1x44xf32>
    %47 = vector.broadcast %46 : vector<2x1x44xf32> to vector<2x8x44xf32>
    %48 = arith.mulf %42, %47 : vector<2x8x44xf32>
    %cst_24 = arith.constant dense<0.000000e+00> : vector<2x8xf32>
    %49 = vector.multi_reduction <add>, %48, %cst_24 [2] : vector<2x8x44xf32> to vector<2x8xf32>
    %50 = vector.shape_cast %49 : vector<2x8xf32> to vector<2x8x1xf32>
    %51 = tpu.reciprocal %50 {approx = true} : vector<2x8x1xf32> -> vector<2x8x1xf32>
    "tpu.trace_start"() <{level = 10 : i32, message = "gnm,gnd->gmd"}> : () -> ()
    %cst_25 = arith.constant dense<0.000000e+00> : vector<2x44x16xf32>
    %52 = tpu.matmul %43, %44, %cst_25 {dimension_numbers = #tpu.dot_dimension_numbers<[1], [1], [2], [2], [0, 0, 0, 2, 1, 2], [0], [0]>} : vector<2x8x44xf32>, vector<2x8x16xf32>, vector<2x44x16xf32> -> vector<2x44x16xf32>
    "tpu.trace_stop"() : () -> ()
    "tpu.trace_start"() <{level = 10 : i32, message = "gnm,gmd->gnd"}> : () -> ()
    %cst_26 = arith.constant dense<0.000000e+00> : vector<2x8x16xf32>
    %53 = tpu.matmul %42, %52, %cst_26 {dimension_numbers = #tpu.dot_dimension_numbers<[2], [1], [1], [2], [0, 0, 0, 1, 1, 2], [0], [0]>} : vector<2x8x44xf32>, vector<2x44x16xf32>, vector<2x8x16xf32> -> vector<2x8x16xf32>
    "tpu.trace_stop"() : () -> ()
    %54 = vector.broadcast %51 : vector<2x8x1xf32> to vector<2x8x16xf32>
    %55 = arith.mulf %53, %54 : vector<2x8x16xf32>
    %c0_27 = arith.constant 0 : index
    %c0_28 = arith.constant 0 : index
    %c0_29 = arith.constant 0 : index
    %56 = vector.load %arg6[%c0_27, %c0_28, %c0_29] : memref<2x8x16xf32, #tpu.memory_space<vmem>>, vector<2x8x16xf32>
    tpu.vector_store %arg6[%c0_27, %c0_28, %c0_29], %55 {strides = array<i32>} : memref<2x8x16xf32, #tpu.memory_space<vmem>>, vector<2x8x16xf32>,
    return
  }
  func.func @transform_0(%arg0: i32) -> i32 {
    %c0_i32 = arith.constant 0 : i32
    %c0_i32_0 = arith.constant 0 : i32
    return %c0_i32 : i32
  }
  func.func @transform_1(%arg0: i32) -> (i32, i32, i32) {
    %c0_i32 = arith.constant 0 : i32
    %c0_i32_0 = arith.constant 0 : i32
    %c0_i32_1 = arith.constant 0 : i32
    return %arg0, %c0_i32, %c0_i32_0 : i32, i32, i32
  }
  func.func @transform_2(%arg0: i32) -> (i32, i32, i32) {
    %c0_i32 = arith.constant 0 : i32
    %c0_i32_0 = arith.constant 0 : i32
    %c0_i32_1 = arith.constant 0 : i32
    return %arg0, %c0_i32, %c0_i32_0 : i32, i32, i32
  }
  func.func @transform_3(%arg0: i32) -> (i32, i32, i32) {
    %c0_i32 = arith.constant 0 : i32
    %c0_i32_0 = arith.constant 0 : i32
    %c0_i32_1 = arith.constant 0 : i32
    return %arg0, %c0_i32, %c0_i32_0 : i32, i32, i32
  }
  func.func @transform_4(%arg0: i32) -> (i32, i32) {
    %c0_i32 = arith.constant 0 : i32
    %c0_i32_0 = arith.constant 0 : i32
    %c0_i32_1 = arith.constant 0 : i32
    return %c0_i32, %c0_i32_0 : i32, i32
  }
  func.func @transform_5(%arg0: i32) -> (i32, i32, i32) {
    %c0_i32 = arith.constant 0 : i32
    %c0_i32_0 = arith.constant 0 : i32
    %c0_i32_1 = arith.constant 0 : i32
    return %arg0, %c0_i32, %c0_i32_0 : i32, i32, i32
  }
}

</mosaic_0001>

<bundles_post_ra>
// kernel: fast_attention.2
= control target key start
LH: loop header
LB: loop body
LE: loop exit
PB: predicated region body
PF: predicated region fallthrough
CT: control target
= control target key end

     0   :  { %s400_s9 = smov 0   ;;  %s460_s0 = inlined_call_operand.vmem [shape: f32[4,8,16], index: 0, kind: input, shape index: {}]   ;;  %s461_s1 = inlined_call_operand.vmem [shape: f32[44,16], index: 1, kind: input, shape index: {}]   ;;  %s462_s2 = inlined_call_operand.vmem [shape: f32[2,1,44], index: 2, kind: output, shape index: {}]  }
   0x1 LB: > { %s406_s10 = sadd.s32 4294967295, %s383_s9   ;;  %p315_p0 = scmp.ge.s32.totalorder %s383_s9, 1  ;;  %s383_s9 = sphi %s400_s9, %s12_s9  }
   0x2   : > { %p113_p1 = scmp.lt.s32.totalorder %s383_s9, 3 }
   0x4   : > { %p114_p2 = pnand %p315_p0, %p113_p1 }
   0x5   : > { %v146_v0 = vld [vmem:[%s461_s1] sm:$0xff] (!%p114_p2)  ;;  %v147_v1 = vld [vmem:[%s461_s1 + $0x8] sm:$0xff] (!%p114_p2)  ;;  %vm152_vm0 = vcmask (!%p114_p2), 130048   ;;  %v148_v2 = vld [vmem:[%s461_s1 + $0x10] sm:$0xff] (!%p114_p2)  ;;  %s316_s17 = sshll.u32 (!%p114_p2), %s406_s10, 1  ;;  %vm252_vm2 = vcmask (!%p114_p2), 359424  }
   0x6   : > { %117 = sbr.rel (%p114_p2) target bundleno = 261 (0x105), region = 28  ;;  %v351_v3 = vpack.c.bf16 (!%p114_p2), %v147_v1, %v146_v0  ;;  %vm422_vm1 = vmpackc.low (!%p114_p2), %vm152_vm0, %vm152_vm0  ;;  %v149_v5 = vld [vmem:[%s461_s1 + $0x18] sm:$0xff] (!%p114_p2)  ;;  %p134_p3 = scmp.lt.s32.totalorder (!%p114_p2), %s316_s17, 3  ;;  %v150_v7 = vld [vmem:[%s461_s1 + $0x20] sm:$0xff] (!%p114_p2)  ;;  %vm262_vm3 = vcmask (!%p114_p2), 352256  }
   0x7   : > { %v357_v6 = vpack.c.bf16 (!%p114_p2), %v149_v5, %v148_v2  ;;  %v151_v8 = vld [vmem:[%s461_s1 + $0x28] sm:$0xf] (!%p114_p2)  ;;  %p139_p4 = scmp.lt.s32.totalorder (!%p114_p2), %s406_s10, 1 }
   0x8   : > { %353 = vmatprep.subr.msk.bf16.mxu0 (!%p114_p2), %vm422_vm1, %v351_v3  ;;  %v363_v11 = vpack.c.bf16 (!%p114_p2), %v151_v8, %v150_v7 }
   0x9   : > { %356 = vmatpush3.bf16.xpose.msk.msra.mxu0 (!%p114_p2), %vm422_vm1, %v351_v3 }
   0xa   : > { %359 = vmatprep.subr.msk.bf16.mxu0 (!%p114_p2), %vm422_vm1, %v357_v6 }
   0xd   : > { %s466_s17 = smov (!%p134_p3, %s316_s17), 3  ;;  %s468_s10 = smov (!%p139_p4, %s406_s10), 1 }
   0xe   : > { %s317_s20 = sshll.u32 %s466_s17, 3  ;;  %s141_s30 = scalar_lea.vmem %s462_s2, %s468_s10 }
   0xf   : > { %s137_s27 = scalar_lea.vmem %s460_s0, %s317_s20 }
  0x10   : > { %v142_v9 = vld [vmem:[%s137_s27] sm:$0xff]  ;;  %v143_v12 = vld [vmem:[%s137_s27 + $0x8] sm:$0xff] }
  0x11   : > { %v144_v10 = vmul.f32 0.5, %v142_v9  ;;  %362 = vmatpush3.bf16.xpose.msk.msra.mxu0 %vm422_vm1, %v357_v6  ;;  %v145_v13 = vmul.f32 0.5, %v143_v12 }
  0x12   : > { %365 = vmatprep.subr.msk.bf16.mxu0 %vm422_vm1, %v363_v11 }
  0x13   : > { %348 = vmatprep.mubr.msk.f32.mxu0 %vm152_vm0, %v144_v10 }
  0x19   : > { %368 = vmatpush3.bf16.xpose.msk.msra.mxu0 %vm422_vm1, %v363_v11 }
  0x20   : > { %349 = vmatmul.mubr.msk.f32.vlgmr.msra.gmra.mrb[0].mxu0 %vm152_vm0, %v145_v13 }
  0xf3   : > { %v350_v14 = vpop.f32.mrb[0].mxu0 }
  0xf4   : > { %v254_v15 = vsel %vm252_vm2, %v350_v14, -inf  ;;  %v243_v16 = vpop.f32.mrb[1].mxu0 }
  0xf5   : > { %v253_v17 = vsel %vm252_vm2, %v243_v16, -inf }
  0xf6   : > { %v255_v18 = vmax.f32 %v253_v17, %v254_v15 }
  0xf8   : > { %v256_v19 = vrot.slane %v255_v18, 4 }
  0xfa   : > { %v257_v20 = vmax.f32 %v255_v18, %v256_v19 }
  0xfc   : > { %v258_v21 = vrot.slane %v257_v20, 2 }
  0xfe   : > { %v259_v22 = vmax.f32 %v257_v20, %v258_v21 }
 0x100   : > { %v260_v23 = vrot.slane %v259_v22, 1 }
 0x102   : > { %v261_v24 = vmax.f32 %v259_v22, %v260_v23 }
 0x104   : > { %263 = vst.msk [vmem:[%s141_s30] sm:$0x1] %vm262_vm3, %v261_v24 }
 0x105 PF: > { %s12_s9 = sadd.s32 1, %s383_s9  }
 0x106   : > { %p9_p5 = scmp.ge.s32.totalorder %s12_s9, 4  }
 0x108   :  { %11 = sbr.rel (!%p9_p5) target bundleno = 1 (0x1), region = 58 }

// kernel: fast_attention.3
= control target key start
LH: loop header
LB: loop body
LE: loop exit
PB: predicated region body
PF: predicated region fallthrough
CT: control target
= control target key end

     0   :  { %s1684_s0 = inlined_call_operand.<no memory space> [shape: f32[1], index: 0, kind: input, shape index: {}]   ;;  %s1685_s1 = inlined_call_operand.vmem [shape: f32[4,8,16], index: 1, kind: input, shape index: {}]   ;;  %s1686_s2 = inlined_call_operand.vmem [shape: f32[4,8,16], index: 2, kind: input, shape index: {}]   ;;  %s1687_s3 = inlined_call_operand.vmem [shape: f32[4,8,16], index: 3, kind: input, shape index: {}]   ;;  %s1688_s4 = inlined_call_operand.vmem [shape: f32[44,16], index: 4, kind: input, shape index: {}]   ;;  %s1689_s5 = inlined_call_operand.hbm [shape: f32[4,8,16], index: 5, kind: output, shape index: {}]  }
   0x1   :  { %10 = sst [smem:[#allocation2]] %s1684_s0 }
   0x2   :  { %11 = vsyncpa [#allocation4], 0 }
   0x3   :  { %13 = vsyncpa [#allocation4 + $0x1], 0  ;;  %s1485_s20 = smov 0   ;;  %s1487_s21 = smov 0  }
   0x4   :  { %s1489_s22 = smov 0   ;;  %s1491_s23 = smov 0  }
   0x5 LB: > { %s1506_s0 = sadd.s32 4294967295, %s1443_s23   ;;  %s1093_s24 = sadd.s32 4294967294, %s1443_s23   ;;  %s1443_s23 = sphi %s1491_s23, %s1699_s23   ;;  %s1439_s22 = sphi %s1489_s22, %s1698_s22   ;;  %s1435_s21 = sphi %s1487_s21, %s1697_s21   ;;  %s1431_s20 = sphi %s1485_s20, %s1696_s20  }
   0x6   : > { %s1510_s25 = sadd.s32 1, %s1443_s23   ;;  %s146_s26 = sadd.s32 1, %s1439_s22 }
   0x7   : > { %s143_s27 = ssub.s32 %s1443_s23, %s1510_s25  ;;  %p156_p0 = scmp.ne.s32.totalorder %s1439_s22, %s1435_s21 }
   0x8   : > { %p144_p1 = scmp.eq.s32.totalorder %s143_s27, 0  ;;  %p157_p2 = scmp.eq.s32.totalorder %s1506_s0, 1 }
   0x9   : > { %p162_p3 = scmp.ne.s32.totalorder %s1435_s21, %s1431_s20  ;;  %p163_p4 = scmp.eq.s32.totalorder %s1093_s24, 1 }
   0xa   : > { %s1521_s28 = scalar_select %p144_p1, %s1439_s22, %s146_s26  }
   0xb   : > { %p1523_p5 = por %p157_p2, %p156_p0  ;;  %p1527_p6 = por %p163_p4, %p162_p3 }
   0xc   : > { %p1096_p7 = scmp.ge.s32.totalorder %s1443_s23, 1  ;;  %p214_p8 = scmp.lt.s32.totalorder %s1443_s23, 3 }
   0xe   : > { %p215_p9 = pnand %p1096_p7, %p214_p8 }
   0xf   : > { %v275_v0 = vld [vmem:[%s1688_s4] sm:$0xff] (!%p215_p9)  ;;  %v276_v1 = vld [vmem:[%s1688_s4 + $0x8] sm:$0xff] (!%p215_p9)  ;;  %vm283_vm0 = vcmask (!%p215_p9), 130048   ;;  %v277_v2 = vld [vmem:[%s1688_s4 + $0x10] sm:$0xff] (!%p215_p9)  ;;  %s1098_s12 = sshll.u32 (!%p215_p9), %s1506_s0, 1  ;;  %s507_s9 = sld [smem:[#allocation2]] (!%p215_p9) }
  0x10   : > { %218 = sbr.rel (%p215_p9) target bundleno = 897 (0x381), region = 40  ;;  %v1268_v3 = vpack.c.bf16 (!%p215_p9), %v276_v1, %v275_v0  ;;  %vm1545_vm1 = vmpackc.low (!%p215_p9), %vm283_vm0, %vm283_vm0  ;;  %v278_v5 = vld [vmem:[%s1688_s4 + $0x18] sm:$0xff] (!%p215_p9)  ;;  %p253_p10 = scmp.lt.s32.totalorder (!%p215_p9), %s1098_s12, 3  ;;  %v279_v7 = vld [vmem:[%s1688_s4 + $0x20] sm:$0xff] (!%p215_p9)  ;;  %vm488_vm2 = vcmask (!%p215_p9), 359424   ;;  %vm577_vm3 = vcmask (!%p215_p9), 64512  }
  0x11   : > { %v1274_v6 = vpack.c.bf16 (!%p215_p9), %v278_v5, %v277_v2  ;;  %v280_v8 = vld [vmem:[%s1688_s4 + $0x28] sm:$0xf] (!%p215_p9)  ;;  %vm1446_vm4 = vmmov (!%p215_p9), 0   ;;  %vm839_vm5 = vcmask (!%p215_p9), 1043456   ;;  %vm1448_vm6 = vmmov (!%p215_p9), 1   ;;  %s249_s13 = sand.u32 (!%p215_p9), 1, %s1435_s21  }
  0x12   : > { %1270 = vmatprep.subr.msk.bf16.mxu0 (!%p215_p9), %vm1545_vm1, %v1268_v3  ;;  %1288 = vmatprep.subr.msk.bf16.mxu1 (!%p215_p9), %vm1545_vm1, %v1268_v3  ;;  %v1280_v15 = vpack.c.bf16 (!%p215_p9), %v280_v8, %v279_v7  ;;  %vm1622_vm7 = vmpackc.low (!%p215_p9), %vm839_vm5, %vm1448_vm6  ;;  %s1097_s14 = sshll.u32 (!%p215_p9), %s249_s13, 4  ;;  %s1141_s17 = sshll.u32 (!%p215_p9), %s1506_s0, 8 }
  0x13   : > { %1273 = vmatpush3.bf16.xpose.msk.msra.mxu0 (!%p215_p9), %vm1545_vm1, %v1268_v3  ;;  %1291 = vmatpush3.bf16.xpose.msk.msra.mxu1 (!%p215_p9), %vm1545_vm1, %v1268_v3  ;;  %s1640_s24 = scalar_lea.hbm (!%p215_p9), %s1689_s5, %s1141_s17  ;;  %s1643_s26 = scalar_lea.sflag (!%p215_p9), [#allocation4], %s249_s13 }
  0x14   : > { %1276 = vmatprep.subr.msk.bf16.mxu0 (!%p215_p9), %vm1545_vm1, %v1274_v6  ;;  %1294 = vmatprep.subr.msk.bf16.mxu1 (!%p215_p9), %vm1545_vm1, %v1274_v6  ;;  %s1449_s0 = smov (!%p215_p9), [#allocation3]  }
  0x15   : > { %v508_v30 = vstv (!%p215_p9), %s507_s9  ;;  %s1385_s6 = sshll.u32 (!%p215_p9), %s1449_s0, 4  ;;  %s1386_s6 = int_to_ptr.vmem [resolvable:$false] %s1385_s6 }
  0x16   : > { %s1387_s7 = scalar_lea.vmem (!%p215_p9), %s1386_s6, 512 }
  0x17   : > { %s1701_s12 = smov (!%p253_p10, %s1098_s12), 3 }
  0x18   : > { %s1564_s15 = sshll.u32 %s1701_s12, 3 }
  0x19   : > { %s256_s27 = scalar_lea.vmem %s1685_s1, %s1564_s15  ;;  %s262_s8 = scalar_lea.vmem %s1686_s2, %s1564_s15 }
  0x1a   : > { %v271_v9 = vld [vmem:[%s256_s27] sm:$0xff]  ;;  %v274_v12 = vld [vmem:[%s262_s8 + $0x8] sm:$0xff]  ;;  %s268_s12 = scalar_lea.vmem %s1687_s3, %s1564_s15  ;;  %s251_s15 = scalar_lea.vmem [#allocation3], %s1097_s14 }
  0x1b   : > { %v273_v10 = vld [vmem:[%s262_s8] sm:$0xff]  ;;  %v281_v11 = vmul.f32 0.5, %v271_v9  ;;  %v477_v16 = vmul.f32 %v274_v12, %v274_v12  ;;  %1279 = vmatpush3.bf16.xpose.msk.msra.mxu0 %vm1545_vm1, %v1274_v6  ;;  %1297 = vmatpush3.bf16.xpose.msk.msra.mxu1 %vm1545_vm1, %v1274_v6  ;;  %v272_v19 = vld [vmem:[%s256_s27 + $0x8] sm:$0xff]  ;;  %v384_v21 = vmul.f32 0.5, %v274_v12  ;;  %v466_v22 = vmul.f32 %v271_v9, %v271_v9  ;;  %s1007_s16 = sshll.u32 %s251_s15, 4  ;;  %s1635_s16 = int_to_ptr.vmem [resolvable:$true] %s1007_s16 }
  0x1c   : > { %v383_v13 = vmul.f32 0.5, %v273_v10  ;;  %v476_v14 = vmul.f32 %v273_v10, %v273_v10  ;;  %1282 = vmatprep.subr.msk.bf16.mxu0 %vm1545_vm1, %v1280_v15  ;;  %1300 = vmatprep.subr.msk.bf16.mxu1 %vm1545_vm1, %v1280_v15  ;;  %v282_v20 = vmul.f32 0.5, %v272_v19  ;;  %v467_v24 = vmul.f32 %v272_v19, %v272_v19  ;;  %v519_v46 = vld [vmem:[%s268_s12] sm:$0xff]  ;;  %v520_v50 = vld [vmem:[%s268_s12 + $0x8] sm:$0xff]  ;;  %s1381_s27 = scalar_lea.vmem %s1635_s16, 256  ;;  %p1388_p0 = scmp.lt.s32.totalorder %s1635_s16, %s1386_s6 }
  0x1d   : > { %1198 = vmatprep.mubr.msk.f32.mxu0 %vm283_vm0, %v281_v11  ;;  %v481_v18 = vsel %vm283_vm0, %v477_v16, 0.0  ;;  %v468_v23 = vsel %vm283_vm0, %v466_v22, 0.0  ;;  %p1382_p11 = scmp.ne.s32.totalorder %s1635_s16, %s1381_s27  ;;  %p1389_p1 = scmp.lt.s32.totalorder %s1387_s7, %s1381_s27 }
  0x1e   : > { %1213 = vmatprep.mubr.msk.f32.mxu1 %vm283_vm0, %v383_v13  ;;  %v478_v17 = vsel %vm283_vm0, %v476_v14, 0.0  ;;  %v471_v25 = vsel %vm283_vm0, %v467_v24, 0.0 }
  0x1f   : > { %479 = vadd.xlane.f32.xlu0 %v478_v17  ;;  %p1383_p12 = pnand %p1382_p11, %p1523_p5  ;;  %p1390_p2 = por %p1389_p1, %p1388_p0 }
  0x21   : > { %p1384_p13 = pneg %p1383_p12 }
  0x23   : > { %482 = vadd.xlane.f32.xlu0 %v481_v18  ;;  %1285 = vmatpush3.bf16.xpose.msk.msra.mxu0 %vm1545_vm1, %v1280_v15  ;;  %p1391_p3 = pnand %p1390_p2, %p1384_p13 }
  0x24   : > { %1303 = vmatpush3.bf16.xpose.msk.msra.mxu1 %vm1545_vm1, %v1280_v15  ;;  %1216 = vmatprep.subr.mxu0 %v519_v46 }
  0x25   : > { %1227 = vmatprep.subr.mxu1 %v520_v50 }
  0x27   : > { %469 = vadd.xlane.f32.xlu0 %v468_v23 }
  0x2a   : > { %1199 = vmatmul.mubr.msk.f32.vlgmr.msra.gmra.mrb[0].mxu0 %vm283_vm0, %v282_v20 }
  0x2b   : > { %1214 = vmatmul.mubr.msk.f32.vlgmr.msra.gmra.mrb[0].mxu1 %vm283_vm0, %v384_v21  ;;  %472 = vadd.xlane.f32.xlu0 %v471_v25 }
  0x2c   : > { %1217 = vmatpush3.msra.mxu0 %v519_v46  ;;  %1228 = vmatpush3.msra.mxu1 %v520_v50 }
  0xac   : > { %v480_v26 = vpop.xlane.xlu0 %479 }
  0xad   : > { %v484_v27 = vmul.f32 0.125, %v480_v26 }
  0xb0   : > { %v483_v37 = vpop.xlane.xlu0 %482 }
  0xb1   : > { %v485_v39 = vmul.f32 0.125, %v483_v37 }
  0xb4   : > { %v470_v51 = vpop.xlane.xlu0 %469 }
  0xb5   : > { %v474_v52 = vmul.f32 0.125, %v470_v51 }
  0xb8   : > { %v473_v53 = vpop.xlane.xlu0 %472 }
  0xb9   : > { %v475_v55 = vmul.f32 0.125, %v473_v53 }
  0xfd   : > { %v1200_v28 = vpop.f32.mrb[0].mxu0 }
  0xfe   : > { %v1215_v29 = vpop.f32.mrb[0].mxu1  ;;  %v374_v31 = vpop.f32.mrb[1].mxu0  ;;  %v492_v36 = vsel %vm488_vm2, %v1200_v28, -inf  ;;  %v487_v61 = vsub.f32 %v1200_v28, %v475_v55 }
  0xff   : > { %v457_v32 = vpop.f32.mrb[1].mxu1  ;;  %v489_v34 = vsel %vm488_vm2, %v374_v31, -inf  ;;  %v506_v40 = vsub.f32 %v1215_v29, %v485_v39  ;;  %v486_v56 = vsub.f32 %v374_v31, %v474_v52 }
 0x100   : > { %v505_v33 = vsub.f32 %v457_v32, %v484_v27  ;;  %490 = vmax.xlane.f32.xlu0 %v489_v34 }
 0x101   : > { %v510_v41 = vsub.f32 %v506_v40, %v508_v30 }
 0x102   : > { %v509_v35 = vsub.f32 %v505_v33, %v508_v30 }
 0x103   : > { %v513_v44 = vmul.f32 1.442695, %v510_v41 }
 0x104   : > { %v511_v38 = vmul.f32 1.442695, %v509_v35  ;;  %493 = vmax.xlane.f32.xlu0 %v492_v36  ;;  %v1445_v35 = vmov 0.0|0.0   ;;  %v1447_v36 = vmov 0.0  }
 0x105   : > { %1304 = vmatprep.subr.bf16.mxu0 %v1445_v35  ;;  %1314 = vmatprep.subr.bf16.mxu1 %v1445_v35 }
 0x106   : > { %1369 = vpow2.f32 %v511_v38 }
 0x107   : > { %1371 = vpow2.f32 %v513_v44 }
 0x110   : > { %v1370_v42 = vpop.eup %1369 }
 0x111   : > { %v515_v43 = vadd.f32 0.0001, %v1370_v42  ;;  %v1372_v47 = vpop.eup %1371 }
 0x112   : > { %v516_v48 = vadd.f32 0.0001, %v1372_v47 }
 0x113   : > { %v517_v45 = vmul.f32 0.15075567, %v515_v43 }
 0x114   : > { %v518_v49 = vmul.f32 0.15075567, %v516_v48 }
 0x115   : > { %545 = vxpose.xlu1.b32.start.end [1/1] (short) (narrow) %v517_v45, 48  ;;  %v521_v54 = vsel %vm488_vm2, %v517_v45, 0.0 }
 0x116   : > { %v522_v57 = vrot.slane %v521_v54, 4  ;;  %v528_v58 = vsel %vm488_vm2, %v518_v49, 0.0 }
 0x117   : > { %v529_v63 = vrot.slane %v528_v58, 4 }
 0x118   : > { %v523_v62 = vadd.f32 %v522_v57, %v521_v54 }
 0x119   : > { %v530_v4 = vadd.f32 %v529_v63, %v528_v58 }
 0x11a   : > { %v524_v3 = vrot.slane %v523_v62, 2 }
 0x11b   : > { %v531_v7 = vrot.slane %v530_v4, 2 }
 0x11c   : > { %v525_v8 = vadd.f32 %v524_v3, %v523_v62 }
 0x11d   : > { %v532_v11 = vadd.f32 %v531_v7, %v530_v4 }
 0x11e   : > { %v526_v10 = vrot.slane %v525_v8, 1 }
 0x11f   : > { %v533_v17 = vrot.slane %v532_v11, 1 }
 0x120   : > { %v527_v16 = vadd.f32 %v526_v10, %v525_v8 }
 0x121   : > { %v534_v24 = vadd.f32 %v533_v17, %v532_v11 }
 0x12a   : > { %691 = vxpose.xlu1.b32.start.end [1/1] (short) (narrow) %v518_v49, 48 }
 0x18d   : > { %v491_v59 = vpop.xlane.xlu0 %490 }
 0x18e   : > { %v495_v60 = vsub.f32 %v486_v56, %v491_v59 }
 0x190   : > { %v497_v0 = vmul.f32 1.442695, %v495_v60 }
 0x191   : > { %v494_v1 = vpop.xlane.xlu0 %493 }
 0x192   : > { %1373 = vpow2.f32 %v497_v0  ;;  %v496_v2 = vsub.f32 %v487_v61, %v494_v1 }
 0x194   : > { %v499_v5 = vmul.f32 1.442695, %v496_v2 }
 0x195   : > { %v561_v6 = vpop.trf.xlu1 }
 0x196   : > { %1218 = vmatprep.mubr.msk.f32.mxu0 %vm577_vm3, %v561_v6  ;;  %1375 = vpow2.f32 %v499_v5 }
 0x199   : > { %v562_v9 = vpop.trf.xlu1 }
 0x19a   : > { %1219 = vmatmul.mubr.msk.f32.vlgmr.msra.gmra.mrb[2].mxu0 %vm577_vm3, %v562_v9 }
 0x19c   : > { %v1374_v12 = vpop.eup %1373 }
 0x19d   : > { %v563_v13 = vpop.trf.xlu1  ;;  %v501_v14 = vadd.f32 0.0001, %v1374_v12 }
 0x19e   : > { %1221 = vmatprep.mubr.msk.f32.mxu0 %vm577_vm3, %v563_v13 }
 0x19f   : > { %v503_v15 = vmul.f32 0.15075567, %v501_v14 }
 0x1a0   : > { %v1376_v18 = vpop.eup %1375 }
 0x1a1   : > { %v564_v19 = vpop.trf.xlu1  ;;  %v502_v20 = vadd.f32 0.0001, %v1376_v18  ;;  %v535_v21 = vmul.f32 %v527_v16, %v503_v15 }
 0x1a2   : > { %1222 = vmatmul.mubr.msk.f32.gmra.mrb[4].mxu0 %vm577_vm3, %v564_v19 }
 0x1a3   : > { %v537_v22 = vsel %vm488_vm2, %v535_v21, 0.0  ;;  %v504_v23 = vmul.f32 0.15075567, %v502_v20 }
 0x1a4   : > { %538 = vadd.xlane.f32.xlu0 %v537_v22 }
 0x1a5   : > { %v565_v25 = vpop.trf.xlu1  ;;  %v536_v26 = vmul.f32 %v534_v24, %v504_v23 }
 0x1a6   : > { %1224 = vmatprep.mubr.msk.f32.mxu0 %vm577_vm3, %v565_v25 }
 0x1a7   : > { %v540_v27 = vsel %vm488_vm2, %v536_v26, 0.0 }
 0x1a8   : > { %541 = vadd.xlane.f32.xlu1 %v540_v27 }
 0x1a9   : > { %v566_v28 = vpop.trf.xlu1 }
 0x1aa   : > { %1225 = vmatmul.mubr.msk.f32.gmra.mrb[6].mxu0 %vm577_vm3, %v566_v28 }
 0x1ab   : > { %1250 = vmatprep.mubr.msk.f32.mxu0 %vm1446_vm4, %v1447_v36 }
 0x1ad   : > { %v707_v29 = vpop.trf.xlu1 }
 0x1ae   : > { %1229 = vmatprep.mubr.msk.f32.mxu1 %vm577_vm3, %v707_v29 }
 0x1b1   : > { %v708_v30 = vpop.trf.xlu1 }
 0x1b2   : > { %1230 = vmatmul.mubr.msk.f32.vlgmr.msra.gmra.mrb[2].mxu1 %vm577_vm3, %v708_v30 }
 0x1b5   : > { %v709_v31 = vpop.trf.xlu1 }
 0x1b6   : > { %1232 = vmatprep.mubr.msk.f32.mxu1 %vm577_vm3, %v709_v31 }
 0x1b9   : > { %v710_v32 = vpop.trf.xlu1 }
 0x1ba   : > { %1233 = vmatmul.mubr.msk.f32.gmra.mrb[4].mxu1 %vm577_vm3, %v710_v32 }
 0x1bd   : > { %v711_v33 = vpop.trf.xlu1 }
 0x1be   : > { %1235 = vmatprep.mubr.msk.f32.mxu1 %vm577_vm3, %v711_v33 }
 0x1c1   : > { %v712_v34 = vpop.trf.xlu1 }
 0x1c2   : > { %1236 = vmatmul.mubr.msk.f32.gmra.mrb[6].mxu1 %vm577_vm3, %v712_v34 }
 0x1c3   : > { %1265 = vmatprep.mubr.msk.f32.mxu1 %vm1446_vm4, %v1447_v36 }
 0x231   : > { %v539_v56 = vpop.xlane.xlu0 %538 }
 0x232   : > { %1377 = vrcp.f32 %v539_v56 }
 0x235   : > { %v542_v61 = vpop.xlane.xlu1 %541 }
 0x236   : > { %1379 = vrcp.f32 %v542_v61 }
 0x23c   : > { %v1378_v57 = vpop.eup %1377 }
 0x240   : > { %v1380_v62 = vpop.eup %1379 }
 0x26d   : > { %v1220_v37 = vpop.f32.mrb[2].mxu0 }
 0x26e   : > { %v662_v38 = vpop.f32.mrb[3].mxu0 }
 0x26f   : > { %v1305_v39 = vpack.c.bf16 %v1220_v37, %v662_v38 }
 0x271   : > { %1306 = vmatpush3.bf16.msra.mxu0 %v1305_v39 }
 0x272   : > { %1307 = vmatprep.subr.bf16.mxu0 %v1445_v35 }
 0x275   : > { %v1223_v40 = vpop.f32.mrb[4].mxu0 }
 0x276   : > { %v672_v41 = vpop.f32.mrb[5].mxu0 }
 0x277   : > { %v1308_v42 = vpack.c.bf16 %v1223_v40, %v672_v41 }
 0x279   : > { %1309 = vmatpush3.bf16.msra.mxu0 %v1308_v42 }
 0x27a   : > { %1310 = vmatprep.subr.bf16.mxu0 %v1445_v35 }
 0x27d   : > { %v1226_v43 = vpop.f32.mrb[6].mxu0 }
 0x27e   : > { %v682_v44 = vpop.f32.mrb[7].mxu0 }
 0x27f   : > { %v1311_v46 = vpack.c.bf16 %v1226_v43, %v682_v44 }
 0x281   : > { %1313 = vmatpush3.bf16.msk.msra.mxu0 %vm1622_vm7, %v1311_v46 }
 0x284   : > { %1251 = vmatmul.mubr.msk.f32.vlgmr.msra.gmra.mrb[8].mxu0 %vm488_vm2, %v503_v15 }
 0x285   : > { %v1231_v47 = vpop.f32.mrb[2].mxu1 }
 0x286   : > { %v807_v48 = vpop.f32.mrb[3].mxu1 }
 0x287   : > { %v1315_v49 = vpack.c.bf16 %v1231_v47, %v807_v48 }
 0x289   : > { %1316 = vmatpush3.bf16.msra.mxu1 %v1315_v49 }
 0x28a   : > { %1317 = vmatprep.subr.bf16.mxu1 %v1445_v35 }
 0x28d   : > { %v1234_v50 = vpop.f32.mrb[4].mxu1 }
 0x28e   : > { %v817_v51 = vpop.f32.mrb[5].mxu1 }
 0x28f   : > { %v1318_v52 = vpack.c.bf16 %v1234_v50, %v817_v51 }
 0x291   : > { %1319 = vmatpush3.bf16.msra.mxu1 %v1318_v52 }
 0x292   : > { %1320 = vmatprep.subr.bf16.mxu1 %v1445_v35 }
 0x295   : > { %v1237_v53 = vpop.f32.mrb[6].mxu1 }
 0x296   : > { %v827_v54 = vpop.f32.mrb[7].mxu1 }
 0x297   : > { %v1321_v55 = vpack.c.bf16 %v1237_v53, %v827_v54 }
 0x299   : > { %1323 = vmatpush3.bf16.msk.msra.mxu1 %vm1622_vm7, %v1321_v55 }
 0x29c   : > { %1266 = vmatmul.mubr.msk.f32.vlgmr.msra.gmra.mrb[8].mxu1 %vm488_vm2, %v504_v23 }
 0x357   : > { %v909_v58 = vpop.f32.mrb[8].mxu0 }
 0x358   : > { %v989_v59 = vmul.f32 %v1378_v57, %v909_v58  ;;  %v1252_v60 = vpop.f32.mrb[9].mxu0 }
 0x35a   : > { %991 = vst.msk [vmem:[%s251_s15] sm:$0xff] %vm283_vm0, %v989_v59 }
 0x36f   : > { %v985_v63 = vpop.f32.mrb[8].mxu1 }
 0x370   : > { %v990_v0 = vmul.f32 %v1380_v62, %v985_v63  ;;  %v1267_v1 = vpop.f32.mrb[9].mxu1 }
 0x372   : > { %992 = vst.msk [vmem:[%s251_s15 + $0x8] sm:$0xff] %vm283_vm0, %v990_v0 }
 0x373   : > { %1394 = shalt.err (!%p1391_p3)
}
 0x374   : > { %s1395_s8 = scalar_lea.hbm %s1640_s24, 256  ;;  %s1399_s11 = scalar_lea.hbm %s1689_s5, 512 }
 0x375   : > { %p1396_p4 = scmp.ne.s32.totalorder %s1640_s24, %s1395_s8  ;;  %p1400_p9 = scmp.lt.u32.totalorder %s1640_s24, %s1689_s5 }
 0x376   : > { %p1401_p10 = scmp.lt.u32.totalorder %s1399_s11, %s1395_s8  ;;  %p1403_p12 = scmp.lt.u32.totalorder %s1395_s8, %s1640_s24 }
 0x377   : > { %p1397_p7 = pnand %p1396_p4, %p1523_p5 }
 0x378   : > { %p1402_p11 = por %p1401_p10, %p1400_p9 }
 0x379   : > { %p1398_p8 = pneg %p1397_p7 }
 0x37a   : > { %p1404_p13 = por %p1403_p12, %p1402_p11 }
 0x37c   : > { %p1405_p0 = pnand %p1404_p13, %p1398_p8 }
 0x37e   : > { %1408 = shalt.err (!%p1405_p0)
}
 0x37f   : > { %s1450_s14 = smov 128   ;;  %s1451_s15 = smov 8  }
 0x380   : > { %1324 = dma.vmem_to_hbm [thread:$0]  (%p1523_p5), %s1635_s16, 256, %s1640_s24, %s1643_s26, %s1450_s14, %s1450_s14, %s1451_s15  }
 0x381 PF: > { %p1330_p1 = scmp.ge.s32.totalorder %s1443_s23, 2  ;;  %s1022_s17 = sand.u32 1, %s1431_s20  }
 0x382   : > { %s1023_s18 = scalar_lea.sflag [#allocation4], %s1022_s17 }
 0x383   : > { %p1327_p2 = pnand %p1330_p1, %p1527_p6 }
 0x385   : > { %1426 = dma.done.wait (!%p1327_p2), %s1023_s18, 256  }
 0x386   : > { %1428 = vsyncadd (!%p1327_p2), %s1023_s18, 4294967040  ;;  %p16_p3 = scmp.ge.s32.totalorder %s1510_s25, 4   ;;  %s1696_s20 = smov %s1435_s21 }
 0x387   : > { %s1697_s21 = smov %s1439_s22  ;;  %s1698_s22 = smov %s1521_s28 }
 0x388   : > { %s1699_s23 = smov %s1510_s25  ;;  %18 = sbr.rel (!%p16_p3) target bundleno = 5 (0x5), region = 81 }
 0x38f   :  { %1028 = vsyncpa [#allocation4], 1 }
 0x390   :  { %1030 = vsyncpa [#allocation4 + $0x1], 1 }

</bundles_post_ra>
